<compile_context>
chip_gen: v7x
topology: tpu7x:2x2x1
jax: 0.10.0
libtpu: 0.0.40
codegen_flags: <defaults>
</compile_context>

<pallas_src>
import jax
import jax.numpy as jnp
from jax.experimental import pallas as pl
from jax.experimental.pallas import tpu as pltpu

N_STATES = 24 + 50 + 3 + 20      # 97
N_ACTIONS = 8 * 3 + 1            # 25
HIDDEN = (128, 256, 128)

IN_PAD = 128                     # 97 padded to one lane group
OUT_PAD = 128                    # 25 padded to one lane group
TB_MAX = 256                     # batch-tile rows (multiple of 16 for bf16 sublanes)


def _round_up(n, m):
    return ((n + m - 1) // m) * m


def mlp_kernel(x_ref,
               w1_ref, b1_ref,
               w2_ref, b2_ref,
               w3_ref, b3_ref,
               w4_ref, b4_ref,
               o_ref):
    # Fully fused forward pass for one (TB, 128) batch tile.
    # bf16 operands -> MXU, f32 accumulation, f32 bias add, bf16 re-cast
    # between layers, lane-dense f32 store at the end.
    x = x_ref[...]                                                   # (TB, 128) bf16

    h = jnp.dot(x, w1_ref[...], preferred_element_type=jnp.float32) + b1_ref[...]
    h = jnp.maximum(h, 0.0).astype(jnp.bfloat16)

    h = jnp.dot(h, w2_ref[...], preferred_element_type=jnp.float32) + b2_ref[...]
    h = jnp.maximum(h, 0.0).astype(jnp.bfloat16)

    h = jnp.dot(h, w3_ref[...], preferred_element_type=jnp.float32) + b3_ref[...]
    h = jnp.maximum(h, 0.0).astype(jnp.bfloat16)

    out = jnp.dot(h, w4_ref[...], preferred_element_type=jnp.float32) + b4_ref[...]
    o_ref[...] = out.astype(o_ref.dtype)                             # (TB, 128) f32


def _prepare_padded_params(params):
    """Pad logical (in, out) weights / (out,) biases to lane-dense bf16/f32 blocks."""
    dims_in = [IN_PAD, HIDDEN[0], HIDDEN[1], HIDDEN[2]]
    dims_out = [HIDDEN[0], HIDDEN[1], HIDDEN[2], OUT_PAD]
    padded = []
    for (w_t, b), din, dout in zip(params, dims_in, dims_out):
        w_bf = w_t.astype(jnp.bfloat16)
        wp = jnp.pad(w_bf, ((0, din - w_bf.shape[0]), (0, dout - w_bf.shape[1])))
        b_f32 = b.astype(jnp.float32).reshape(1, -1)
        bp = jnp.pad(b_f32, ((0, 0), (0, dout - b_f32.shape[1])))
        padded.append((wp, bp))
    return padded


@jax.jit
def net_forward(x, params):
    """x: (B, N_STATES) float32.  params: list of (W_t (in,out) f32, b (out,) f32)."""
    B = x.shape[0]
    TB = min(TB_MAX, _round_up(max(B, 1), 16))
    Bp = _round_up(B, TB)

    # Zero-pad input to (Bp, 128) bf16 (rows beyond B and cols beyond 97 are 0).
    x_p = jnp.pad(x.astype(jnp.bfloat16),
                  ((0, Bp - B), (0, IN_PAD - N_STATES)))

    padded = _prepare_padded_params(params)
    flat_params = [t for wb in padded for t in wb]

    grid = (Bp // TB,)

    in_specs = [pl.BlockSpec((TB, IN_PAD), lambda i: (i, 0))]
    for w, b in padded:
        # Constant index_map: weights/biases stay VMEM-resident across grid steps.
        in_specs.append(pl.BlockSpec(w.shape, lambda i: (0, 0)))
        in_specs.append(pl.BlockSpec(b.shape, lambda i: (0, 0)))
    out_specs = pl.BlockSpec((TB, OUT_PAD), lambda i: (i, 0))

    flops = 2 * Bp * (IN_PAD * HIDDEN[0]
                      + HIDDEN[0] * HIDDEN[1]
                      + HIDDEN[1] * HIDDEN[2]
                      + HIDDEN[2] * OUT_PAD)
    weight_bytes = sum(w.size * w.dtype.itemsize + b.size * b.dtype.itemsize
                       for w, b in padded)
    bytes_accessed = (x_p.size * x_p.dtype.itemsize
                      + weight_bytes
                      + Bp * OUT_PAD * 4)

    out_padded = pl.pallas_call(
        mlp_kernel,
        out_shape=jax.ShapeDtypeStruct((Bp, OUT_PAD), jnp.float32),
        grid=grid,
        in_specs=in_specs,
        out_specs=out_specs,
        compiler_params=pltpu.CompilerParams(
            dimension_semantics=("parallel",)),
        cost_estimate=pl.CostEstimate(
            flops=flops, transcendentals=0, bytes_accessed=bytes_accessed),
    )(x_p, *flat_params)

    # Slice away batch + action padding.
    return out_padded[:B, :N_ACTIONS]


def init_params(key):
    """Mirror the PyTorch module init: weights ~ Normal(0, 0.1),
    biases ~ Uniform(-1/sqrt(fan_in), 1/sqrt(fan_in)) (torch Linear default).
    Stored transposed as (in_dim, out_dim) so the kernel computes x @ W + b."""
    dims = [N_STATES, HIDDEN[0], HIDDEN[1], HIDDEN[2], N_ACTIONS]
    params = []
    for i in range(len(dims) - 1):
        key, kw, kb = jax.random.split(key, 3)
        fan_in, fan_out = dims[i], dims[i + 1]
        w_t = (0.1 * jax.random.normal(kw, (fan_in, fan_out))).astype(jnp.float32)
        bound = 1.0 / (fan_in ** 0.5)
        b = jax.random.uniform(kb, (fan_out,), minval=-bound, maxval=bound).astype(jnp.float32)
        params.append((w_t, b))
    return params


def reference_forward(x, params):
    """Plain-JAX reference mirroring the kernel's bf16-operand / f32-accum math."""
    h = x.astype(jnp.bfloat16)
    for i, (w_t, b) in enumerate(params):
        h = jnp.dot(h, w_t.astype(jnp.bfloat16),
                    preferred_element_type=jnp.float32) + b
        if i < len(params) - 1:
            h = jnp.maximum(h, 0.0).astype(jnp.bfloat16)
    return h


if __name__ == "__main__":
    key = jax.random.PRNGKey(0)
    k_x, k_p = jax.random.split(key)

    # NOTE: at B=8 this is launch/overhead-bound; batch >=128 environments per
    # call to actually load the MXU.  The kernel itself scales to large B via
    # the batch grid.
    B = 8
    x = jax.random.normal(k_x, (B, N_STATES), dtype=jnp.float32)
    params = init_params(k_p)

    actions_value = net_forward(x, params)
    jax.block_until_ready(actions_value)

    ref = reference_forward(x, params)
    assert actions_value.shape == (B, N_ACTIONS)
    assert jnp.allclose(actions_value, ref, atol=2e-2, rtol=2e-2), (
        float(jnp.max(jnp.abs(actions_value - ref))))

    print("KERNEL_OK")
</pallas_src>

<mosaic_0001>
module attributes {stable_mosaic.version = 11 : i64} {
  func.func @mlp_kernel(%arg0: i32, %arg1: memref<16x128xbf16, #tpu.memory_space<vmem>>, %arg2: memref<128x128xbf16, #tpu.memory_space<vmem>>, %arg3: memref<1x128xf32, #tpu.memory_space<vmem>>, %arg4: memref<128x256xbf16, #tpu.memory_space<vmem>>, %arg5: memref<1x256xf32, #tpu.memory_space<vmem>>, %arg6: memref<256x128xbf16, #tpu.memory_space<vmem>>, %arg7: memref<1x128xf32, #tpu.memory_space<vmem>>, %arg8: memref<128x128xbf16, #tpu.memory_space<vmem>>, %arg9: memref<1x128xf32, #tpu.memory_space<vmem>>, %arg10: memref<16x128xf32, #tpu.memory_space<vmem>>) attributes {dimension_semantics = [#tpu.dimension_semantics<parallel>], iteration_bounds = array<i64: 1>, scalar_prefetch = 0 : i64, scratch_operands = 0 : i64, tpu.core_type = #tpu.core_type<tc>, window_params = [{transform_indices = @transform_0, window_bounds = array<i64: 16, 128>}, {pipeline_mode = #tpu.pipeline_mode<synchronous>, transform_indices = @transform_1, window_bounds = array<i64: 128, 128>}, {pipeline_mode = #tpu.pipeline_mode<synchronous>, transform_indices = @transform_2, window_bounds = array<i64: 1, 128>}, {pipeline_mode = #tpu.pipeline_mode<synchronous>, transform_indices = @transform_3, window_bounds = array<i64: 128, 256>}, {pipeline_mode = #tpu.pipeline_mode<synchronous>, transform_indices = @transform_4, window_bounds = array<i64: 1, 256>}, {pipeline_mode = #tpu.pipeline_mode<synchronous>, transform_indices = @transform_5, window_bounds = array<i64: 256, 128>}, {pipeline_mode = #tpu.pipeline_mode<synchronous>, transform_indices = @transform_6, window_bounds = array<i64: 1, 128>}, {pipeline_mode = #tpu.pipeline_mode<synchronous>, transform_indices = @transform_7, window_bounds = array<i64: 128, 128>}, {pipeline_mode = #tpu.pipeline_mode<synchronous>, transform_indices = @transform_8, window_bounds = array<i64: 1, 128>}, {transform_indices = @transform_9, window_bounds = array<i64: 16, 128>}]} {
    %c0 = arith.constant 0 : index
    %c0_0 = arith.constant 0 : index
    %0 = vector.load %arg1[%c0, %c0_0] : memref<16x128xbf16, #tpu.memory_space<vmem>>, vector<16x128xbf16>
    %c0_1 = arith.constant 0 : index
    %c0_2 = arith.constant 0 : index
    %1 = vector.load %arg2[%c0_1, %c0_2] : memref<128x128xbf16, #tpu.memory_space<vmem>>, vector<128x128xbf16>
    %cst = arith.constant dense<0.000000e+00> : vector<16x128xf32>
    %2 = tpu.matmul %0, %1, %cst {dimension_numbers = #tpu.dot_dimension_numbers<[1], [0], [0], [1], [0, 0, 1, 1], [], []>} : vector<16x128xbf16>, vector<128x128xbf16>, vector<16x128xf32> -> vector<16x128xf32>
    %c0_3 = arith.constant 0 : index
    %c0_4 = arith.constant 0 : index
    %3 = vector.load %arg3[%c0_3, %c0_4] : memref<1x128xf32, #tpu.memory_space<vmem>>, vector<1x128xf32>
    %4 = vector.broadcast %3 : vector<1x128xf32> to vector<16x128xf32>
    %5 = arith.addf %2, %4 : vector<16x128xf32>
    %cst_5 = arith.constant 0.000000e+00 : f32
    %6 = vector.broadcast %cst_5 : f32 to vector<16x128xf32>
    %7 = arith.maximumf %5, %6 : vector<16x128xf32>
    %8 = arith.truncf %7 : vector<16x128xf32> to vector<16x128xbf16>
    %c0_6 = arith.constant 0 : index
    %c0_7 = arith.constant 0 : index
    %9 = vector.load %arg4[%c0_6, %c0_7] : memref<128x256xbf16, #tpu.memory_space<vmem>>, vector<128x256xbf16>
    %cst_8 = arith.constant dense<0.000000e+00> : vector<16x256xf32>
    %10 = tpu.matmul %8, %9, %cst_8 {dimension_numbers = #tpu.dot_dimension_numbers<[1], [0], [0], [1], [0, 0, 1, 1], [], []>} : vector<16x128xbf16>, vector<128x256xbf16>, vector<16x256xf32> -> vector<16x256xf32>
    %c0_9 = arith.constant 0 : index
    %c0_10 = arith.constant 0 : index
    %11 = vector.load %arg5[%c0_9, %c0_10] : memref<1x256xf32, #tpu.memory_space<vmem>>, vector<1x256xf32>
    %12 = vector.broadcast %11 : vector<1x256xf32> to vector<16x256xf32>
    %13 = arith.addf %10, %12 : vector<16x256xf32>
    %cst_11 = arith.constant 0.000000e+00 : f32
    %14 = vector.broadcast %cst_11 : f32 to vector<16x256xf32>
    %15 = arith.maximumf %13, %14 : vector<16x256xf32>
    %16 = arith.truncf %15 : vector<16x256xf32> to vector<16x256xbf16>
    %c0_12 = arith.constant 0 : index
    %c0_13 = arith.constant 0 : index
    %17 = vector.load %arg6[%c0_12, %c0_13] : memref<256x128xbf16, #tpu.memory_space<vmem>>, vector<256x128xbf16>
    %cst_14 = arith.constant dense<0.000000e+00> : vector<16x128xf32>
    %18 = tpu.matmul %16, %17, %cst_14 {dimension_numbers = #tpu.dot_dimension_numbers<[1], [0], [0], [1], [0, 0, 1, 1], [], []>} : vector<16x256xbf16>, vector<256x128xbf16>, vector<16x128xf32> -> vector<16x128xf32>
    %c0_15 = arith.constant 0 : index
    %c0_16 = arith.constant 0 : index
    %19 = vector.load %arg7[%c0_15, %c0_16] : memref<1x128xf32, #tpu.memory_space<vmem>>, vector<1x128xf32>
    %20 = vector.broadcast %19 : vector<1x128xf32> to vector<16x128xf32>
    %21 = arith.addf %18, %20 : vector<16x128xf32>
    %cst_17 = arith.constant 0.000000e+00 : f32
    %22 = vector.broadcast %cst_17 : f32 to vector<16x128xf32>
    %23 = arith.maximumf %21, %22 : vector<16x128xf32>
    %24 = arith.truncf %23 : vector<16x128xf32> to vector<16x128xbf16>
    %c0_18 = arith.constant 0 : index
    %c0_19 = arith.constant 0 : index
    %25 = vector.load %arg8[%c0_18, %c0_19] : memref<128x128xbf16, #tpu.memory_space<vmem>>, vector<128x128xbf16>
    %cst_20 = arith.constant dense<0.000000e+00> : vector<16x128xf32>
    %26 = tpu.matmul %24, %25, %cst_20 {dimension_numbers = #tpu.dot_dimension_numbers<[1], [0], [0], [1], [0, 0, 1, 1], [], []>} : vector<16x128xbf16>, vector<128x128xbf16>, vector<16x128xf32> -> vector<16x128xf32>
    %c0_21 = arith.constant 0 : index
    %c0_22 = arith.constant 0 : index
    %27 = vector.load %arg9[%c0_21, %c0_22] : memref<1x128xf32, #tpu.memory_space<vmem>>, vector<1x128xf32>
    %28 = vector.broadcast %27 : vector<1x128xf32> to vector<16x128xf32>
    %29 = arith.addf %26, %28 : vector<16x128xf32>
    %c0_23 = arith.constant 0 : index
    %c0_24 = arith.constant 0 : index
    %30 = vector.load %arg10[%c0_23, %c0_24] : memref<16x128xf32, #tpu.memory_space<vmem>>, vector<16x128xf32>
    tpu.vector_store %arg10[%c0_23, %c0_24], %29 {strides = array<i32>} : memref<16x128xf32, #tpu.memory_space<vmem>>, vector<16x128xf32>,
    return
  }
  func.func @transform_0(%arg0: i32) -> (i32, i32) {
    %c0_i32 = arith.constant 0 : i32
    %c0_i32_0 = arith.constant 0 : i32
    return %arg0, %c0_i32 : i32, i32
  }
  func.func @transform_1(%arg0: i32) -> (i32, i32) {
    %c0_i32 = arith.constant 0 : i32
    %c0_i32_0 = arith.constant 0 : i32
    %c0_i32_1 = arith.constant 0 : i32
    return %c0_i32, %c0_i32_0 : i32, i32
  }
  func.func @transform_2(%arg0: i32) -> (i32, i32) {
    %c0_i32 = arith.constant 0 : i32
    %c0_i32_0 = arith.constant 0 : i32
    %c0_i32_1 = arith.constant 0 : i32
    return %c0_i32, %c0_i32_0 : i32, i32
  }
  func.func @transform_3(%arg0: i32) -> (i32, i32) {
    %c0_i32 = arith.constant 0 : i32
    %c0_i32_0 = arith.constant 0 : i32
    %c0_i32_1 = arith.constant 0 : i32
    return %c0_i32, %c0_i32_0 : i32, i32
  }
  func.func @transform_4(%arg0: i32) -> (i32, i32) {
    %c0_i32 = arith.constant 0 : i32
    %c0_i32_0 = arith.constant 0 : i32
    %c0_i32_1 = arith.constant 0 : i32
    return %c0_i32, %c0_i32_0 : i32, i32
  }
  func.func @transform_5(%arg0: i32) -> (i32, i32) {
    %c0_i32 = arith.constant 0 : i32
    %c0_i32_0 = arith.constant 0 : i32
    %c0_i32_1 = arith.constant 0 : i32
    return %c0_i32, %c0_i32_0 : i32, i32
  }
  func.func @transform_6(%arg0: i32) -> (i32, i32) {
    %c0_i32 = arith.constant 0 : i32
    %c0_i32_0 = arith.constant 0 : i32
    %c0_i32_1 = arith.constant 0 : i32
    return %c0_i32, %c0_i32_0 : i32, i32
  }
  func.func @transform_7(%arg0: i32) -> (i32, i32) {
    %c0_i32 = arith.constant 0 : i32
    %c0_i32_0 = arith.constant 0 : i32
    %c0_i32_1 = arith.constant 0 : i32
    return %c0_i32, %c0_i32_0 : i32, i32
  }
  func.func @transform_8(%arg0: i32) -> (i32, i32) {
    %c0_i32 = arith.constant 0 : i32
    %c0_i32_0 = arith.constant 0 : i32
    %c0_i32_1 = arith.constant 0 : i32
    return %c0_i32, %c0_i32_0 : i32, i32
  }
  func.func @transform_9(%arg0: i32) -> (i32, i32) {
    %c0_i32 = arith.constant 0 : i32
    %c0_i32_0 = arith.constant 0 : i32
    return %arg0, %c0_i32 : i32, i32
  }
}

</mosaic_0001>

<bundles_post_ra>
// kernel: net_forward.1
= control target key start
LH: loop header
LB: loop body
LE: loop exit
PB: predicated region body
PF: predicated region fallthrough
CT: control target
= control target key end

     0   :  { %v802_v0 = vmov 0.0   ;;  %vm803_vm0 = vmmov 0   ;;  %v804_v26 = vmov 0   ;;  %v174_v58 = vlaneseq  ;;  %s1040_s1 = inlined_call_operand.vmem [shape: bf16[128,128], index: 1, kind: input, shape index: {}]   ;;  %s1041_s3 = inlined_call_operand.vmem [shape: bf16[128,256], index: 3, kind: input, shape index: {}]   ;;  %s1042_s0 = inlined_call_operand.vmem [shape: bf16[16,128], index: 0, kind: input, shape index: {}]   ;;  %s1043_s5 = inlined_call_operand.vmem [shape: bf16[256,128], index: 5, kind: input, shape index: {}]   ;;  %s1044_s2 = inlined_call_operand.vmem [shape: f32[1,128], index: 2, kind: input, shape index: {}]   ;;  %s1045_s7 = inlined_call_operand.vmem [shape: bf16[128,128], index: 7, kind: input, shape index: {}]   ;;  %s1046_s4 = inlined_call_operand.vmem [shape: f32[1,256], index: 4, kind: input, shape index: {}]   ;;  %s1047_s6 = inlined_call_operand.vmem [shape: f32[1,128], index: 6, kind: input, shape index: {}]   ;;  %s1048_s8 = inlined_call_operand.vmem [shape: f32[1,128], index: 8, kind: input, shape index: {}]   ;;  %s1049_s9 = inlined_call_operand.vmem [shape: f32[16,128], index: 9, kind: output, shape index: {}]  }
   0x1   :  { %702 = vmatprep.subr.bf16.mxu0 %v802_v0  ;;  %v745_v1 = vld [vmem:[%s1040_s1] sm:$0xff]   ;;  %718 = vmatprep.mubr.msk.bf16.mxu0 %vm803_vm0, %v802_v0  ;;  %v746_v2 = vld [vmem:[%s1040_s1 + $0x8] sm:$0xff]   ;;  %v747_v3 = vld [vmem:[%s1040_s1 + $0x10] sm:$0xff]  }
   0x2   :  { %703 = vmatpush3.bf16.msra.mxu0 %v745_v1  ;;  %v748_v4 = vld [vmem:[%s1040_s1 + $0x18] sm:$0xff]   ;;  %v754_v5 = vld [vmem:[%s1041_s3 + $0x4] ss:$8 sps:$4 sm:$0xff]   ;;  %v756_v6 = vld [vmem:[%s1041_s3] ss:$8 sps:$4 sm:$0xff]   ;;  %296 = vmatprep.mubr.bf16.mxu1 %v804_v26  ;;  %v175_v59 = vshrl.u32 %v174_v58, 7 }
   0x3   :  { %704 = vmatprep.subr.bf16.mxu0 %v802_v0  ;;  %264 = vmatprep.subr.bf16.mxu1 %v754_v5  ;;  %v757_v7 = vld [vmem:[%s1041_s3 + $0x14] ss:$8 sps:$4 sm:$0xff]   ;;  %v759_v8 = vld [vmem:[%s1041_s3 + $0x10] ss:$8 sps:$4 sm:$0xff]   ;;  %v760_v9 = vld [vmem:[%s1041_s3 + $0x24] ss:$8 sps:$4 sm:$0xff]  }
   0x4   :  { %265 = vmatpush1.bf16.msra.mxu1 %v756_v6  ;;  %v749_v10 = vld [vmem:[%s1040_s1 + $0x20] sm:$0xff]   ;;  %v763_v12 = vld [vmem:[%s1041_s3 + $0x34] ss:$8 sps:$4 sm:$0xff]   ;;  %v750_v13 = vld [vmem:[%s1040_s1 + $0x28] sm:$0xff]   ;;  %v176_v60 = vsub.s32 0, %v175_v59  ;;  %v180_v62 = vsub.s32 1, %v175_v59 }
   0x5   :  { %266 = vmatprep.subr.bf16.mxu1 %v757_v7  ;;  %v762_v11 = vld [vmem:[%s1041_s3 + $0x20] ss:$8 sps:$4 sm:$0xff]   ;;  %v765_v14 = vld [vmem:[%s1041_s3 + $0x30] ss:$8 sps:$4 sm:$0xff]   ;;  %v766_v15 = vld [vmem:[%s1041_s3 + $0x44] ss:$8 sps:$4 sm:$0xff]  }
   0x6   :  { %705 = vmatpush3.bf16.msra.mxu0 %v746_v2  ;;  %v751_v16 = vld [vmem:[%s1040_s1 + $0x30] sm:$0xff]   ;;  %v768_v17 = vld [vmem:[%s1041_s3 + $0x40] ss:$8 sps:$4 sm:$0xff]   ;;  %v752_v19 = vld [vmem:[%s1040_s1 + $0x38] sm:$0xff]  }
   0x7   :  { %706 = vmatprep.subr.bf16.mxu0 %v802_v0  ;;  %v769_v18 = vld [vmem:[%s1041_s3 + $0x54] ss:$8 sps:$4 sm:$0xff]   ;;  %v771_v20 = vld [vmem:[%s1041_s3 + $0x50] ss:$8 sps:$4 sm:$0xff]   ;;  %v753_v21 = vld [vmem:[%s1042_s0] sm:$0xff]  }
   0x8   :  { %267 = vmatpush1.bf16.msra.mxu1 %v759_v8  ;;  %v772_v22 = vld [vmem:[%s1041_s3 + $0x64] ss:$8 sps:$4 sm:$0xff]   ;;  %v774_v23 = vld [vmem:[%s1041_s3 + $0x60] ss:$8 sps:$4 sm:$0xff]   ;;  %v775_v24 = vld [vmem:[%s1041_s3 + $0x74] ss:$8 sps:$4 sm:$0xff]  }
   0x9   :  { %268 = vmatprep.subr.bf16.mxu1 %v760_v9  ;;  %v777_v25 = vld [vmem:[%s1041_s3 + $0x70] ss:$8 sps:$4 sm:$0xff]   ;;  %v778_v27 = vld [vmem:[%s1043_s5 + $0x40] sm:$0xff]   ;;  %v780_v29 = vld [vmem:[%s1043_s5 + $0x48] sm:$0xff]  }
   0xa   :  { %707 = vmatpush3.bf16.msra.mxu0 %v747_v3  ;;  %v779_v28 = vld [vmem:[%s1043_s5] sm:$0xff]   ;;  %v781_v30 = vld [vmem:[%s1043_s5 + $0x8] sm:$0xff]   ;;  %v782_v31 = vld [vmem:[%s1043_s5 + $0x50] sm:$0xff]  }
   0xb   :  { %708 = vmatprep.subr.bf16.mxu0 %v802_v0  ;;  %v783_v32 = vld [vmem:[%s1043_s5 + $0x10] sm:$0xff]   ;;  %v784_v33 = vld [vmem:[%s1043_s5 + $0x58] sm:$0xff]   ;;  %v786_v35 = vld [vmem:[%s1043_s5 + $0x60] sm:$0xff]  }
   0xc   :  { %269 = vmatpush1.bf16.msra.mxu1 %v762_v11  ;;  %v785_v34 = vld [vmem:[%s1043_s5 + $0x18] sm:$0xff]   ;;  %v787_v36 = vld [vmem:[%s1043_s5 + $0x20] sm:$0xff]   ;;  %v788_v37 = vld [vmem:[%s1043_s5 + $0x68] sm:$0xff]  }
   0xd   :  { %270 = vmatprep.subr.bf16.mxu1 %v763_v12  ;;  %v610_v38 = vld [vmem:[%s1044_s2] ss:$0 sm:$0xff]  ;;  %v789_v48 = vld [vmem:[%s1043_s5 + $0x28] sm:$0xff]   ;;  %v790_v49 = vld [vmem:[%s1043_s5 + $0x70] sm:$0xff]  }
   0xe   :  { %709 = vmatpush3.bf16.msra.mxu0 %v748_v4  ;;  %v791_v50 = vld [vmem:[%s1043_s5 + $0x30] sm:$0xff]   ;;  %v792_v51 = vld [vmem:[%s1043_s5 + $0x78] sm:$0xff]   ;;  %v794_v53 = vld [vmem:[%s1045_s7] sm:$0xff]  }
   0xf   :  { %710 = vmatprep.subr.bf16.mxu0 %v802_v0  ;;  %v793_v52 = vld [vmem:[%s1043_s5 + $0x38] sm:$0xff]   ;;  %v795_v54 = vld [vmem:[%s1045_s7 + $0x8] sm:$0xff]   ;;  %v796_v55 = vld [vmem:[%s1045_s7 + $0x10] sm:$0xff]  }
  0x10   :  { %271 = vmatpush1.bf16.msra.mxu1 %v765_v14  ;;  %v797_v56 = vld [vmem:[%s1045_s7 + $0x18] sm:$0xff]   ;;  %v798_v57 = vld [vmem:[%s1045_s7 + $0x20] sm:$0xff]  }
  0x11   :  { %272 = vmatprep.subr.bf16.mxu1 %v766_v15  ;;  %v172_v61 = vld [vmem:[%s1046_s4] sm:$0x3] }
  0x12   :  { %711 = vmatpush3.bf16.msra.mxu0 %v749_v10  ;;  %v177_v63 = vrot.slane %v172_v61, %v176_v60  ;;  %v181_v1 = vrot.slane %v172_v61, %v180_v62 }
  0x13   :  { %712 = vmatprep.subr.bf16.mxu0 %v802_v0 }
  0x14   :  { %273 = vmatpush1.bf16.msra.mxu1 %v768_v17  ;;  %v800_v17 = vld [vmem:[%s1045_s7 + $0x30] sm:$0xff]  }
  0x15   :  { %274 = vmatprep.subr.bf16.mxu1 %v769_v18  ;;  %v801_v18 = vld [vmem:[%s1045_s7 + $0x38] sm:$0xff]  }
  0x16   :  { %713 = vmatpush3.bf16.msra.mxu0 %v750_v13 }
  0x17   :  { %714 = vmatprep.subr.bf16.mxu0 %v802_v0 }
  0x18   :  { %275 = vmatpush1.bf16.msra.mxu1 %v771_v20  ;;  %v636_v20 = vld [vmem:[%s1047_s6] ss:$0 sm:$0xff] }
  0x19   :  { %276 = vmatprep.subr.bf16.mxu1 %v772_v22 }
  0x1a   :  { %715 = vmatpush3.bf16.msra.mxu0 %v751_v16  ;;  %v799_v16 = vld [vmem:[%s1045_s7 + $0x28] sm:$0xff]  }
  0x1b   :  { %716 = vmatprep.subr.bf16.mxu0 %v802_v0 }
  0x1c   :  { %277 = vmatpush1.bf16.msra.mxu1 %v774_v23 }
  0x1d   :  { %278 = vmatprep.subr.bf16.mxu1 %v775_v24 }
  0x1e   :  { %717 = vmatpush3.bf16.msra.mxu0 %v752_v19 }
  0x1f   :  { %671 = vmatprep.subr.bf16.mxu0 %v778_v27 }
  0x20   :  { %279 = vmatpush1.bf16.msra.mxu1 %v777_v25 }
  0x21   :  { %719 = vmatmul.mubr.bf16.vlgmr.msra.gmra.mrb[0].mxu0 %v753_v21  ;;  %722 = vmatprep.subr.bf16.mxu1 %v802_v0 }
  0x22   :  { %672 = vmatpush3.bf16.msra.mxu0 %v779_v28 }
  0x23   :  { %673 = vmatprep.subr.bf16.mxu0 %v780_v29 }
  0x26   :  { %674 = vmatpush3.bf16.msra.mxu0 %v781_v30  ;;  %v653_v30 = vld [vmem:[%s1048_s8] ss:$0 sm:$0xff] }
  0x27   :  { %675 = vmatprep.subr.bf16.mxu0 %v782_v31 }
  0x2a   :  { %676 = vmatpush3.bf16.msra.mxu0 %v783_v32 }
  0x2b   :  { %677 = vmatprep.subr.bf16.mxu0 %v784_v33 }
  0x2e   :  { %678 = vmatpush3.bf16.msra.mxu0 %v785_v34 }
  0x2f   :  { %679 = vmatprep.subr.bf16.mxu0 %v786_v35 }
  0x32   :  { %680 = vmatpush3.bf16.msra.mxu0 %v787_v36 }
  0x33   :  { %681 = vmatprep.subr.bf16.mxu0 %v788_v37 }
  0x36   :  { %682 = vmatpush3.bf16.msra.mxu0 %v789_v48 }
  0x37   :  { %683 = vmatprep.subr.bf16.mxu0 %v790_v49 }
  0x3a   :  { %684 = vmatpush3.bf16.msra.mxu0 %v791_v50 }
  0x3b   :  { %685 = vmatprep.subr.bf16.mxu0 %v792_v51 }
  0x3e   :  { %686 = vmatpush3.bf16.msra.mxu0 %v793_v52 }
  0xf4   :  { %v146_v39 = vpop.f32.mrb[0].mxu0 }
  0xf5   :  { %v147_v40 = vadd.f32 %v610_v38, %v146_v39  ;;  %v720_v41 = vpop.f32.mrb[1].mxu0 }
  0xf6   :  { %v149_v42 = vpop.f32.mrb[2].mxu0 }
  0xf7   :  { %v150_v43 = vadd.f32 %v610_v38, %v149_v42  ;;  %v721_v44 = vpop.f32.mrb[3].mxu0  ;;  %v153_v45 = vmax.f32 %v147_v40, 0.0 }
  0xf9   :  { %v154_v46 = vmax.f32 %v150_v43, 0.0 }
  0xfb   :  { %v155_v47 = vpack.c.bf16 %v154_v46, %v153_v45 }
  0xfd   :  { %297 = vmatmul.mubr.bf16.vlgmr.msra.gmra.mrb[0].mxu1 %v155_v47 }
  0xfe   :  { %738 = vmatprep.mubr.msk.bf16.mxu1 %vm803_vm0, %v802_v0  ;;  %723 = vmatpush3.bf16.msra.mxu1 %v794_v53 }
  0xff   :  { %724 = vmatprep.subr.bf16.mxu1 %v802_v0 }
 0x102   :  { %725 = vmatpush3.bf16.msra.mxu1 %v795_v54 }
 0x103   :  { %726 = vmatprep.subr.bf16.mxu1 %v802_v0 }
 0x106   :  { %727 = vmatpush3.bf16.msra.mxu1 %v796_v55 }
 0x107   :  { %728 = vmatprep.subr.bf16.mxu1 %v802_v0 }
 0x10a   :  { %729 = vmatpush3.bf16.msra.mxu1 %v797_v56 }
 0x10b   :  { %730 = vmatprep.subr.bf16.mxu1 %v802_v0 }
 0x10e   :  { %731 = vmatpush3.bf16.msra.mxu1 %v798_v57 }
 0x10f   :  { %732 = vmatprep.subr.bf16.mxu1 %v802_v0 }
 0x112   :  { %733 = vmatpush3.bf16.msra.mxu1 %v799_v16 }
 0x113   :  { %734 = vmatprep.subr.bf16.mxu1 %v802_v0 }
 0x116   :  { %735 = vmatpush3.bf16.msra.mxu1 %v800_v17 }
 0x117   :  { %736 = vmatprep.subr.bf16.mxu1 %v802_v0 }
 0x11a   :  { %737 = vmatpush3.bf16.msra.mxu1 %v801_v18 }
 0x1d0   :  { %v298_v2 = vpop.f32.mrb[0].mxu1 }
 0x1d1   :  { %v299_v3 = vadd.f32 %v298_v2, %v177_v63  ;;  %v300_v4 = vpop.f32.mrb[1].mxu1 }
 0x1d2   :  { %v301_v5 = vadd.f32 %v300_v4, %v181_v1  ;;  %v302_v6 = vpop.f32.mrb[2].mxu1 }
 0x1d3   :  { %v303_v7 = vadd.f32 %v302_v6, %v177_v63  ;;  %v304_v8 = vpop.f32.mrb[3].mxu1  ;;  %v307_v10 = vmax.f32 %v299_v3, 0.0 }
 0x1d4   :  { %v305_v9 = vadd.f32 %v304_v8, %v181_v1  ;;  %v308_v12 = vmax.f32 %v301_v5, 0.0 }
 0x1d5   :  { %v309_v11 = vmax.f32 %v303_v7, 0.0 }
 0x1d6   :  { %v310_v13 = vmax.f32 %v305_v9, 0.0 }
 0x1d7   :  { %v311_v14 = vpack.c.bf16 %v309_v11, %v307_v10 }
 0x1d8   :  { %v312_v15 = vpack.c.bf16 %v310_v13, %v308_v12 }
 0x1da   :  { %480 = vmatprep.mubr.bf16.mxu0 %v312_v15 }
 0x1db   :  { %481 = vmatmul.mubr.bf16.vlgmr.msra.gmra.mrb[4].mxu0 %v311_v14 }
 0x2ae   :  { %v687_v19 = vpop.f32.mrb[4].mxu0 }
 0x2af   :  { %v688_v21 = vpop.f32.mrb[5].mxu0 }
 0x2b0   :  { %v689_v22 = vadd.f32 %v688_v21, %v687_v19  ;;  %v690_v23 = vpop.f32.mrb[6].mxu0 }
 0x2b1   :  { %v691_v24 = vpop.f32.mrb[7].mxu0 }
 0x2b2   :  { %v483_v25 = vadd.f32 %v689_v22, %v636_v20  ;;  %v692_v26 = vadd.f32 %v691_v24, %v690_v23 }
 0x2b4   :  { %v486_v27 = vadd.f32 %v692_v26, %v636_v20  ;;  %v489_v28 = vmax.f32 %v483_v25, 0.0 }
 0x2b6   :  { %v490_v29 = vmax.f32 %v486_v27, 0.0 }
 0x2b8   :  { %v491_v0 = vpack.c.bf16 %v490_v29, %v489_v28 }
 0x2ba   :  { %739 = vmatmul.mubr.bf16.vlgmr.msra.gmra.mrb[4].mxu1 %v491_v0 }
 0x38d   :  { %v597_v31 = vpop.f32.mrb[4].mxu1 }
 0x38e   :  { %v598_v32 = vadd.f32 %v653_v30, %v597_v31  ;;  %v740_v33 = vpop.f32.mrb[5].mxu1 }
 0x38f   :  { %v600_v34 = vpop.f32.mrb[6].mxu1 }
 0x390   :  { %604 = vst [vmem:[%s1049_s9] sm:$0xff] %v598_v32  ;;  %v601_v35 = vadd.f32 %v653_v30, %v600_v34  ;;  %v741_v36 = vpop.f32.mrb[7].mxu1 }
 0x392   :  { %605 = vst [vmem:[%s1049_s9 + $0x8] sm:$0xff] %v601_v35 }

</bundles_post_ra>
